<compile_context>
chip_gen: v7x
topology: tpu7x:2x2x1
jax: 0.10.0
libtpu: 0.0.40
codegen_flags: <defaults>
</compile_context>

<pallas_src>
import functools

import jax
import jax.numpy as jnp
import numpy as np
from jax.experimental import pallas as pl
from jax.experimental.pallas import tpu as pltpu

_LANE = 128                      # channel padding unit / lane width
_TM_CAP = 512                    # max row tile (sublane dim), multiple of 8
_VMEM_LIMIT = 48 * 1024 * 1024   # safe on v7x (64 MiB/TC), > default on v5e/v6e


def _round_up(x, m):
    return (x + m - 1) // m * m


def _tile_m(m, cap=_TM_CAP):
    """Row tile <= cap; if everything fits one tile, split in two so the
    'parallel' M axis can shard across both TensorCores (megacore)."""
    mp8 = _round_up(m, 8)
    if mp8 <= cap:
        tm = _round_up((mp8 + 1) // 2, 8) if mp8 > 8 else mp8
    else:
        tm = cap
    return tm, _round_up(m, tm)


# ----------------------------- Pallas kernels ------------------------------

def _conv1x1_bn_kernel(x_ref, w_ref, b_ref, o_ref, *, relu):
    """1x1-conv GEMM, BN scale pre-folded into the resident weight.
    x block: (tm, Cin) (cast to bf16 here), w: (Cin, Np) bf16, b: (1, Np) f32."""
    acc = jnp.dot(x_ref[...].astype(jnp.bfloat16), w_ref[...],
                  preferred_element_type=jnp.float32)
    out = acc + b_ref[...]
    if relu:
        out = jnp.maximum(out, 0.0)
    o_ref[...] = out.astype(o_ref.dtype)


def _conv3x3_bn_kernel(x_ref, w_ref, b_ref, o_ref, *, stride, wph, lout):
    """Implicit-GEMM 3x3 conv: 9 bf16 matmuls over row-shifted contiguous
    slices of the flattened, phase-decomposed input block, f32 accumulation,
    fused BN bias + ReLU.  x block: (1, s*s, Lin, Cp); w: (9, Cp, Coutp)."""
    s = stride
    acc = None
    for t in range(9):
        dh, dw = t // 3, t % 3
        phase = (dh % s) * s + (dw % s)
        off = (dh // s) * wph + (dw // s)
        lhs = x_ref[0, phase, off:off + lout, :]          # (Lout, Cp) bf16
        part = jnp.dot(lhs, w_ref[t], preferred_element_type=jnp.float32)
        acc = part if acc is None else acc + part
    out = jnp.maximum(acc + b_ref[...], 0.0)
    o_ref[0] = out.astype(o_ref.dtype)


def _conv3_shortcut_kernel(y_ref, x_ref, w3_ref, wsc_ref, b_ref, o_ref):
    """Fused conv3 (1x1 + BN) + shortcut (1x1 + BN) + residual + final ReLU.
    Two bf16 matmuls sharing the same row tile; resident weights."""
    acc = jnp.dot(y_ref[...].astype(jnp.bfloat16), w3_ref[...],
                  preferred_element_type=jnp.float32)
    acc = acc + jnp.dot(x_ref[...].astype(jnp.bfloat16), wsc_ref[...],
                        preferred_element_type=jnp.float32)
    out = jnp.maximum(acc + b_ref[...], 0.0)
    o_ref[...] = out.astype(o_ref.dtype)


# ------------------------------ kernel wrappers -----------------------------

def conv1x1_bn(x2d, w2d, bias, *, relu, out_dtype=jnp.bfloat16):
    """x2d: (M, K) float, w2d: (K, Np) bf16 (BN folded, Np % 128 == 0),
    bias: (Np,) f32.  Weight VMEM-resident, single-pass epilogue."""
    M, K = x2d.shape
    Kw, Np = w2d.shape
    assert K == Kw and Np % _LANE == 0
    tm, Mp = _tile_m(M)
    if Mp != M:
        x2d = jnp.pad(x2d, ((0, Mp - M), (0, 0)))
    b2d = bias.astype(jnp.float32).reshape(1, Np)

    cost = pl.CostEstimate(
        flops=2 * Mp * K * Np, transcendentals=0,
        bytes_accessed=(Mp * K * x2d.dtype.itemsize + K * Np * 2 + Np * 4
                        + Mp * Np * jnp.dtype(out_dtype).itemsize))

    out = pl.pallas_call(
        functools.partial(_conv1x1_bn_kernel, relu=relu),
        out_shape=jax.ShapeDtypeStruct((Mp, Np), out_dtype),
        grid=(Mp // tm,),
        in_specs=[
            pl.BlockSpec((tm, K), lambda i: (i, 0)),
            pl.BlockSpec((K, Np), lambda i: (0, 0)),        # resident weight
            pl.BlockSpec((1, Np), lambda i: (0, 0)),
        ],
        out_specs=pl.BlockSpec((tm, Np), lambda i: (i, 0)),
        compiler_params=pltpu.CompilerParams(
            dimension_semantics=("parallel",),
            vmem_limit_bytes=_VMEM_LIMIT),
        cost_estimate=cost,
    )(x2d, w2d, b2d)
    return out[:M]


def conv3x3_bn(y_nhwc, w_taps, bias, *, stride):
    """y_nhwc: (N, H, W, Cp) bf16 (channels 128-padded), w_taps: (9, Cp, Coutp)
    bf16 (BN folded), bias: (Coutp,) f32, stride in {1, 2}.
    Returns (N, Ho, Wo, Coutp) bf16 via an in-kernel implicit GEMM."""
    N, H, W, Cp = y_nhwc.shape
    _, _, Coutp = w_taps.shape
    s = int(stride)
    Ho = (H - 1) // s + 1
    Wo = (W - 1) // s + 1
    Hpad = _round_up(H + 2, s)
    Wpad = _round_up(W + 2, s)
    Hph, Wph = Hpad // s, Wpad // s
    Lout = _round_up(Ho * Wph, 8)
    max_off = (2 // s) * Wph + (2 // s)
    Lin = _round_up(max(Hph * Wph, Lout + max_off), 8)

    # Spatial pad + phase decomposition + flatten (one cheap XLA pass;
    # the transpose is layout-trivial for stride 1).
    yp = jnp.pad(y_nhwc, ((0, 0), (1, Hpad - H - 1), (1, Wpad - W - 1), (0, 0)))
    yph = yp.reshape(N, Hph, s, Wph, s, Cp).transpose(0, 2, 4, 1, 3, 5)
    yph = yph.reshape(N, s * s, Hph * Wph, Cp)
    yph = jnp.pad(yph, ((0, 0), (0, 0), (0, Lin - Hph * Wph), (0, 0)))

    b2d = bias.astype(jnp.float32).reshape(1, Coutp)
    cost = pl.CostEstimate(
        flops=2 * 9 * N * Lout * Cp * Coutp, transcendentals=0,
        bytes_accessed=(N * s * s * Lin * Cp * 2 + 9 * Cp * Coutp * 2
                        + Coutp * 4 + N * Lout * Coutp * 2))

    out = pl.pallas_call(
        functools.partial(_conv3x3_bn_kernel, stride=s, wph=Wph, lout=Lout),
        out_shape=jax.ShapeDtypeStruct((N, Lout, Coutp), jnp.bfloat16),
        grid=(N,),
        in_specs=[
            pl.BlockSpec((1, s * s, Lin, Cp), lambda n: (n, 0, 0, 0)),
            pl.BlockSpec((9, Cp, Coutp), lambda n: (0, 0, 0)),   # resident
            pl.BlockSpec((1, Coutp), lambda n: (0, 0)),
        ],
        out_specs=pl.BlockSpec((1, Lout, Coutp), lambda n: (n, 0, 0)),
        compiler_params=pltpu.CompilerParams(
            dimension_semantics=("parallel",),
            vmem_limit_bytes=_VMEM_LIMIT),
        cost_estimate=cost,
    )(yph, w_taps, b2d)

    out = out[:, :Ho * Wph, :].reshape(N, Ho, Wph, Coutp)[:, :, :Wo, :]
    return out


def conv3_shortcut(y2d, xsc2d, w3, wsc, bias, *, out_dtype=jnp.bfloat16):
    """Fused conv3 (1x1, BN) + shortcut (1x1 stride-s, BN) + residual + ReLU.
    y2d: (M, K3) bf16, xsc2d: (M, Ksc) f32, weights bf16 (BN folded),
    bias: (Np,) f32 = b3 + bsc.  Both weights VMEM-resident."""
    M, K3 = y2d.shape
    Msc, Ksc = xsc2d.shape
    assert M == Msc
    _, Np = w3.shape
    assert wsc.shape[1] == Np and Np % _LANE == 0
    tm, Mp = _tile_m(M)
    if Mp != M:
        y2d = jnp.pad(y2d, ((0, Mp - M), (0, 0)))
        xsc2d = jnp.pad(xsc2d, ((0, Mp - M), (0, 0)))
    b2d = bias.astype(jnp.float32).reshape(1, Np)

    cost = pl.CostEstimate(
        flops=2 * Mp * Np * (K3 + Ksc), transcendentals=0,
        bytes_accessed=(Mp * K3 * y2d.dtype.itemsize
                        + Mp * Ksc * xsc2d.dtype.itemsize
                        + (K3 + Ksc) * Np * 2 + Np * 4
                        + Mp * Np * jnp.dtype(out_dtype).itemsize))

    out = pl.pallas_call(
        _conv3_shortcut_kernel,
        out_shape=jax.ShapeDtypeStruct((Mp, Np), out_dtype),
        grid=(Mp // tm,),
        in_specs=[
            pl.BlockSpec((tm, K3), lambda i: (i, 0)),
            pl.BlockSpec((tm, Ksc), lambda i: (i, 0)),
            pl.BlockSpec((K3, Np), lambda i: (0, 0)),       # resident
            pl.BlockSpec((Ksc, Np), lambda i: (0, 0)),      # resident
            pl.BlockSpec((1, Np), lambda i: (0, 0)),
        ],
        out_specs=pl.BlockSpec((tm, Np), lambda i: (i, 0)),
        compiler_params=pltpu.CompilerParams(
            dimension_semantics=("parallel",),
            vmem_limit_bytes=_VMEM_LIMIT),
        cost_estimate=cost,
    )(y2d, xsc2d, w3, wsc, b2d)
    return out[:M]


# ------------------------------- glue (JAX) ---------------------------------

def fold_bn(gamma, beta, mean, var, eps=1e-5):
    scale = gamma / jnp.sqrt(var + eps)
    return scale, beta - mean * scale


def _fold_1x1(w, bn, cin_pad, cout_pad):
    """torch (Cout, Cin, 1, 1) -> (cin_pad, cout_pad) bf16 with BN scale
    folded into the columns; bias (cout_pad,) f32."""
    s, b = fold_bn(*bn)
    cout, cin = w.shape[0], w.shape[1]
    w2d = jnp.transpose(w[:, :, 0, 0], (1, 0)) * s[None, :]
    w2d = jnp.pad(w2d, ((0, cin_pad - cin), (0, cout_pad - cout)))
    return w2d.astype(jnp.bfloat16), jnp.pad(b, (0, cout_pad - cout))


def _fold_3x3(w, bn, cin_pad, cout_pad):
    """torch (Cout, Cin, 3, 3) -> (9, cin_pad, cout_pad) bf16 (tap-major,
    t = kh*3 + kw) with BN scale folded; bias (cout_pad,) f32."""
    s, b = fold_bn(*bn)
    cout, cin = w.shape[0], w.shape[1]
    w4 = jnp.transpose(w, (2, 3, 1, 0)) * s[None, None, None, :]
    w4 = jnp.pad(w4, ((0, 0), (0, 0), (0, cin_pad - cin), (0, cout_pad - cout)))
    return (w4.reshape(9, cin_pad, cout_pad).astype(jnp.bfloat16),
            jnp.pad(b, (0, cout_pad - cout)))


def bottleneck_forward(x_nchw, params, strides):
    """Reproduces BottleNeck.forward (eval-mode BN).  x_nchw: (N, Cin, H, W) f32."""
    N, Cin, H, W = x_nchw.shape
    Cmid = params["w1"].shape[0]
    Cout4 = params["w3"].shape[0]
    s = int(strides)

    Cmid_p = _round_up(Cmid, _LANE)
    Cout4_p = _round_up(Cout4, _LANE)

    # Fold eval-mode BN into weight columns / biases; pad output channels to
    # 128 multiples (padded lanes stay exactly 0 through every stage).
    w1_2d, b1 = _fold_1x1(params["w1"], params["bn1"], Cin, Cmid_p)
    w2_t, b2 = _fold_3x3(params["w2"], params["bn2"], Cmid_p, Cmid_p)
    w3_2d, b3 = _fold_1x1(params["w3"], params["bn3"], Cmid_p, Cout4_p)
    wsc_2d, bsc = _fold_1x1(params["wsc"], params["bnsc"], Cin, Cout4_p)

    x = jnp.transpose(x_nchw, (0, 2, 3, 1))                 # NHWC, f32

    # conv1: 1x1 stride 1 + BN + ReLU (f32 -> bf16 cast happens in-kernel).
    y1 = conv1x1_bn(x.reshape(N * H * W, Cin), w1_2d, b1, relu=True)
    y1 = y1.reshape(N, H, W, Cmid_p)

    # conv2: 3x3 stride s pad 1 + BN + ReLU (in-kernel implicit GEMM).
    y2 = conv3x3_bn(y1, w2_t, b2, stride=s)                  # (N, Ho, Wo, Cmid_p)
    _, Ho, Wo, _ = y2.shape

    # conv3 (1x1 + BN) fused with shortcut (1x1 stride s + BN), residual add
    # and final ReLU; shortcut rows cast to bf16 inside the kernel.
    x_sc = x[:, ::s, ::s, :].reshape(N * Ho * Wo, Cin)
    out = conv3_shortcut(y2.reshape(N * Ho * Wo, Cmid_p), x_sc,
                         w3_2d, wsc_2d, b3 + bsc)

    out = out[:, :Cout4].reshape(N, Ho, Wo, Cout4)
    return jnp.transpose(out, (0, 3, 1, 2)).astype(jnp.float32)   # NCHW f32


# --------------------------- pure-JAX reference ------------------------------

def _ref_conv(x_nhwc, w_oihw, stride, pad):
    return jax.lax.conv_general_dilated(
        x_nhwc, jnp.transpose(w_oihw, (2, 3, 1, 0)),
        window_strides=(stride, stride), padding=[(pad, pad), (pad, pad)],
        dimension_numbers=("NHWC", "HWIO", "NHWC"))


def bottleneck_ref(x_nchw, params, strides):
    x = jnp.transpose(x_nchw, (0, 2, 3, 1))

    def bn(y, p):
        s, b = fold_bn(*p)
        return y * s + b

    y = jnp.maximum(bn(_ref_conv(x, params["w1"], 1, 0), params["bn1"]), 0.0)
    y = jnp.maximum(bn(_ref_conv(y, params["w2"], strides, 1), params["bn2"]), 0.0)
    y = bn(_ref_conv(y, params["w3"], 1, 0), params["bn3"])
    sc = bn(_ref_conv(x, params["wsc"], strides, 0), params["bnsc"])
    out = jnp.maximum(y + sc, 0.0)
    return jnp.transpose(out, (0, 3, 1, 2))


# ----------------------------------- main ------------------------------------

if __name__ == "__main__":
    key = jax.random.PRNGKey(0)
    N, Cin, H, W = 2, 8, 16, 16
    Cout = 4
    strides = 2

    ks = jax.random.split(key, 16)

    def bn_params(k, c):
        k1, k2, k3, k4 = jax.random.split(k, 4)
        gamma = 1.0 + 0.1 * jax.random.normal(k1, (c,), jnp.float32)
        beta = 0.1 * jax.random.normal(k2, (c,), jnp.float32)
        mean = 0.1 * jax.random.normal(k3, (c,), jnp.float32)
        var = jnp.abs(jax.random.normal(k4, (c,), jnp.float32)) + 0.5
        return (gamma, beta, mean, var)

    params = {
        "w1": 0.1 * jax.random.normal(ks[0], (Cout, Cin, 1, 1), jnp.float32),
        "bn1": bn_params(ks[1], Cout),
        "w2": 0.1 * jax.random.normal(ks[2], (Cout, Cout, 3, 3), jnp.float32),
        "bn2": bn_params(ks[3], Cout),
        "w3": 0.1 * jax.random.normal(ks[4], (4 * Cout, Cout, 1, 1), jnp.float32),
        "bn3": bn_params(ks[5], 4 * Cout),
        "wsc": 0.1 * jax.random.normal(ks[6], (4 * Cout, Cin, 1, 1), jnp.float32),
        "bnsc": bn_params(ks[7], 4 * Cout),
    }

    x = jax.random.normal(ks[8], (N, Cin, H, W), jnp.float32)

    out = bottleneck_forward(x, params, strides)
    out = jax.block_until_ready(out)

    ref = jax.block_until_ready(bottleneck_ref(x, params, strides))
    # bf16 matmul inputs / bf16 intermediates vs f32 reference -> loosened tol.
    np.testing.assert_allclose(np.asarray(out), np.asarray(ref),
                               rtol=2e-2, atol=2e-2)

    print("KERNEL_OK")
</pallas_src>

<mosaic_0001>
module attributes {stable_mosaic.version = 11 : i64} {
  func.func @_conv1x1_bn_kernel(%arg0: i32, %arg1: memref<256x8xf32, #tpu.memory_space<vmem>>, %arg2: memref<8x128xbf16, #tpu.memory_space<vmem>>, %arg3: memref<1x128xf32, #tpu.memory_space<vmem>>, %arg4: memref<256x128xbf16, #tpu.memory_space<vmem>>) attributes {dimension_semantics = [#tpu.dimension_semantics<parallel>], iteration_bounds = array<i64: 2>, scalar_prefetch = 0 : i64, scratch_operands = 0 : i64, tpu.core_type = #tpu.core_type<tc>, window_params = [{transform_indices = @transform_0, window_bounds = array<i64: 256, 8>}, {pipeline_mode = #tpu.pipeline_mode<synchronous>, transform_indices = @transform_1, window_bounds = array<i64: 8, 128>}, {pipeline_mode = #tpu.pipeline_mode<synchronous>, transform_indices = @transform_2, window_bounds = array<i64: 1, 128>}, {transform_indices = @transform_3, window_bounds = array<i64: 256, 128>}]} {
    %c0 = arith.constant 0 : index
    %c0_0 = arith.constant 0 : index
    %0 = vector.load %arg1[%c0, %c0_0] : memref<256x8xf32, #tpu.memory_space<vmem>>, vector<256x8xf32>
    %1 = arith.truncf %0 : vector<256x8xf32> to vector<256x8xbf16>
    %c0_1 = arith.constant 0 : index
    %c0_2 = arith.constant 0 : index
    %2 = vector.load %arg2[%c0_1, %c0_2] : memref<8x128xbf16, #tpu.memory_space<vmem>>, vector<8x128xbf16>
    %cst = arith.constant dense<0.000000e+00> : vector<256x128xf32>
    %3 = tpu.matmul %1, %2, %cst {dimension_numbers = #tpu.dot_dimension_numbers<[1], [0], [0], [1], [0, 0, 1, 1], [], []>} : vector<256x8xbf16>, vector<8x128xbf16>, vector<256x128xf32> -> vector<256x128xf32>
    %c0_3 = arith.constant 0 : index
    %c0_4 = arith.constant 0 : index
    %4 = vector.load %arg3[%c0_3, %c0_4] : memref<1x128xf32, #tpu.memory_space<vmem>>, vector<1x128xf32>
    %5 = vector.broadcast %4 : vector<1x128xf32> to vector<256x128xf32>
    %6 = arith.addf %3, %5 : vector<256x128xf32>
    %cst_5 = arith.constant 0.000000e+00 : f32
    %7 = vector.broadcast %cst_5 : f32 to vector<256x128xf32>
    %8 = arith.maximumf %6, %7 : vector<256x128xf32>
    %9 = arith.truncf %8 : vector<256x128xf32> to vector<256x128xbf16>
    %c0_6 = arith.constant 0 : index
    %c0_7 = arith.constant 0 : index
    %10 = vector.load %arg4[%c0_6, %c0_7] : memref<256x128xbf16, #tpu.memory_space<vmem>>, vector<256x128xbf16>
    tpu.vector_store %arg4[%c0_6, %c0_7], %9 {strides = array<i32>} : memref<256x128xbf16, #tpu.memory_space<vmem>>, vector<256x128xbf16>,
    return
  }
  func.func @transform_0(%arg0: i32) -> (i32, i32) {
    %c0_i32 = arith.constant 0 : i32
    %c0_i32_0 = arith.constant 0 : i32
    return %arg0, %c0_i32 : i32, i32
  }
  func.func @transform_1(%arg0: i32) -> (i32, i32) {
    %c0_i32 = arith.constant 0 : i32
    %c0_i32_0 = arith.constant 0 : i32
    %c0_i32_1 = arith.constant 0 : i32
    return %c0_i32, %c0_i32_0 : i32, i32
  }
  func.func @transform_2(%arg0: i32) -> (i32, i32) {
    %c0_i32 = arith.constant 0 : i32
    %c0_i32_0 = arith.constant 0 : i32
    %c0_i32_1 = arith.constant 0 : i32
    return %c0_i32, %c0_i32_0 : i32, i32
  }
  func.func @transform_3(%arg0: i32) -> (i32, i32) {
    %c0_i32 = arith.constant 0 : i32
    %c0_i32_0 = arith.constant 0 : i32
    return %arg0, %c0_i32 : i32, i32
  }
}

</mosaic_0001>

<bundles_post_ra>
// kernel: tpu_custom_call.1
= control target key start
LH: loop header
LB: loop body
LE: loop exit
PB: predicated region body
PF: predicated region fallthrough
CT: control target
= control target key end

     0   :  { %8 = vsyncpa [#allocation3], 0  ;;  %s1298_s0 = inlined_call_operand.vmem [shape: f32[512,8], index: 0, kind: input, shape index: {}]   ;;  %s1299_s1 = inlined_call_operand.vmem [shape: bf16[8,128], index: 1, kind: input, shape index: {}]   ;;  %s1300_s2 = inlined_call_operand.vmem [shape: f32[1,128], index: 2, kind: input, shape index: {}]   ;;  %s1301_s3 = inlined_call_operand.hbm [shape: bf16[512,128], index: 3, kind: output, shape index: {}]  }
   0x1   :  { %10 = vsyncpa [#allocation3 + $0x1], 0  ;;  %s1083_s12 = smov 0   ;;  %s1085_s13 = smov 0  }
   0x2   :  { %s1087_s14 = smov 0   ;;  %s1089_s15 = smov 0  }
   0x3 LB: > { %s1104_s16 = sadd.s32 4294967295, %s1058_s15   ;;  %s711_s17 = sadd.s32 4294967294, %s1058_s15   ;;  %s1058_s15 = sphi %s1089_s15, %s1307_s15   ;;  %s1054_s14 = sphi %s1087_s14, %s1306_s14   ;;  %s1050_s13 = sphi %s1085_s13, %s1305_s13   ;;  %s1046_s12 = sphi %s1083_s12, %s1304_s12  }
   0x4   : > { %s1108_s18 = sadd.s32 1, %s1058_s15   ;;  %s91_s19 = sadd.s32 1, %s1054_s14 }
   0x5   : > { %s88_s20 = ssub.s32 %s1058_s15, %s1108_s18  ;;  %p101_p0 = scmp.ne.s32.totalorder %s1054_s14, %s1050_s13 }
   0x6   : > { %p89_p1 = scmp.eq.s32.totalorder %s88_s20, 0  ;;  %p102_p2 = scmp.eq.s32.totalorder %s1104_s16, 1 }
   0x7   : > { %p107_p3 = scmp.ne.s32.totalorder %s1050_s13, %s1046_s12  ;;  %p108_p4 = scmp.eq.s32.totalorder %s711_s17, 1 }
   0x8   : > { %s1119_s21 = scalar_select %p89_p1, %s1054_s14, %s91_s19  }
   0x9   : > { %p1121_p5 = por %p102_p2, %p101_p0  ;;  %p1125_p6 = por %p108_p4, %p107_p3 }
   0xa   : > { %p714_p7 = scmp.ge.s32.totalorder %s1058_s15, 1  ;;  %p141_p8 = scmp.lt.s32.totalorder %s1058_s15, 3 }
   0xc   : > { %p142_p9 = pnand %p714_p7, %p141_p8 }
   0xd   : > { %v221_v0 = vld [vmem:[%s1299_s1] sm:$0xf] (!%p142_p9)  ;;  %vm278_vm0 = vcmask (!%p142_p9), 1043456   ;;  %s716_s26 = sshll.u32 (!%p142_p9), %s1104_s16, 5  ;;  %vm229_vm1 = vcmask (!%p142_p9), 64512   ;;  %s162_s6 = sand.u32 (!%p142_p9), 1, %s1050_s13  }
   0xe   : > { %145 = sbr.rel (%p142_p9) target bundleno = 289 (0x121), region = 32  ;;  %953 = vmatprep.subr.msk.bf16.mxu0 (!%p142_p9), %vm278_vm0, %v221_v0  ;;  %954 = vmatprep.subr.msk.bf16.mxu1 (!%p142_p9), %vm278_vm0, %v221_v0  ;;  %v280_v1 = vsel (!%p142_p9), %vm278_vm0, %v221_v0, 0  ;;  %p166_p10 = scmp.lt.s32.totalorder (!%p142_p9), %s716_s26, 63  ;;  %v1191_v50 = vld [vmem:[%s1300_s2] ss:$0 sm:$0xff] (!%p142_p9) }
   0xf   : > { %918 = vmatpush3.bf16.msra.mxu0 (!%p142_p9), %v280_v1  ;;  %952 = vmatpush3.bf16.msra.mxu1 (!%p142_p9), %v280_v1  ;;  %s715_s7 = sshll.u32 (!%p142_p9), %s162_s6, 7  ;;  %s804_s9 = sshll.u32 (!%p142_p9), %s1104_s16, 11 }
  0x10   : > { %s1204_s8 = scalar_lea.vmem (!%p142_p9), [#allocation2], %s715_s7  ;;  %s1247_s19 = scalar_lea.hbm (!%p142_p9), %s1301_s3, %s804_s9 }
  0x11   : > { %s649_s10 = sshll.u32 (!%p142_p9), %s1204_s8, 4  ;;  %s1257_s16 = scalar_lea.sflag (!%p142_p9), [#allocation3], %s162_s6  ;;  %s1249_s10 = int_to_ptr.vmem [resolvable:$true] %s649_s10 }
  0x12   : > { %s996_s20 = scalar_lea.vmem (!%p142_p9), %s1249_s10, 2048  ;;  %s1060_s24 = smov (!%p142_p9), [#allocation2]  }
  0x13   : > { %p997_p11 = scmp.ne.s32.totalorder (!%p142_p9), %s1249_s10, %s996_s20  ;;  %s1000_s25 = sshll.u32 (!%p142_p9), %s1060_s24, 4  ;;  %s1001_s25 = int_to_ptr.vmem [resolvable:$false] %s1000_s25 }
  0x14   : > { %p1003_p0 = scmp.lt.s32.totalorder (!%p142_p9), %s1249_s10, %s1001_s25 }
  0x15   : > { %s1309_s26 = smov (!%p166_p10, %s716_s26), 63  ;;  %p998_p12 = pnand %p997_p11, %p1121_p5 }
  0x16   : > { %s717_s27 = sshll.u32 %s1309_s26, 3  ;;  %s1002_s26 = scalar_lea.vmem %s1001_s25, 4096 }
  0x17   : > { %s1138_s30 = scalar_lea.vmem %s1298_s0, %s717_s27  ;;  %p999_p13 = pneg %p998_p12 }
  0x18   : > { %v173_v2 = vld [vmem:[%s1138_s30] sm:$0xff]  ;;  %v174_v3 = vld [vmem:[%s1138_s30 + $0x8] sm:$0xff]  ;;  %v175_v7 = vld [vmem:[%s1138_s30 + $0x10] sm:$0xff]  ;;  %p1004_p1 = scmp.lt.s32.totalorder %s1002_s26, %s996_s20 }
  0x19   : > { %v189_v4 = vld [vmem:[%s1138_s30 + $0x80] sm:$0xff]  ;;  %v205_v5 = vpack.c.bf16 %v174_v3, %v173_v2  ;;  %v190_v6 = vld [vmem:[%s1138_s30 + $0x88] sm:$0xff]  ;;  %v176_v8 = vld [vmem:[%s1138_s30 + $0x18] sm:$0xff] }
  0x1a   : > { %v213_v9 = vpack.c.bf16 %v190_v6, %v189_v4  ;;  %v206_v10 = vpack.c.bf16 %v176_v8, %v175_v7  ;;  %v191_v11 = vld [vmem:[%s1138_s30 + $0x90] sm:$0xff]  ;;  %v192_v12 = vld [vmem:[%s1138_s30 + $0x98] sm:$0xff]  ;;  %v177_v13 = vld [vmem:[%s1138_s30 + $0x20] sm:$0xff]  ;;  %p1005_p2 = por %p1004_p1, %p1003_p0 }
  0x1b   : > { %919 = vmatprep.mubr.msk.bf16.mxu0 %vm229_vm1, %v205_v5  ;;  %v214_v14 = vpack.c.bf16 %v192_v12, %v191_v11  ;;  %v178_v15 = vld [vmem:[%s1138_s30 + $0x28] sm:$0xff]  ;;  %v193_v16 = vld [vmem:[%s1138_s30 + $0xa0] sm:$0xff]  ;;  %v179_v20 = vld [vmem:[%s1138_s30 + $0x30] sm:$0xff] }
  0x1c   : > { %v194_v17 = vld [vmem:[%s1138_s30 + $0xa8] sm:$0xff]  ;;  %935 = vmatprep.mubr.msk.bf16.mxu1 %vm229_vm1, %v213_v9  ;;  %920 = vmatmul.mubr.msk.bf16.vlgmr.msra.gmra.mrb[0].mxu0 %vm229_vm1, %v206_v10  ;;  %v207_v18 = vpack.c.bf16 %v178_v15, %v177_v13  ;;  %v180_v21 = vld [vmem:[%s1138_s30 + $0x38] sm:$0xff]  ;;  %v195_v22 = vld [vmem:[%s1138_s30 + $0xb0] sm:$0xff]  ;;  %p1006_p3 = pnand %p1005_p2, %p999_p13 }
  0x1d   : > { %v215_v19 = vpack.c.bf16 %v194_v17, %v193_v16  ;;  %936 = vmatmul.mubr.msk.bf16.vlgmr.msra.gmra.mrb[0].mxu1 %vm229_vm1, %v214_v14  ;;  %v196_v23 = vld [vmem:[%s1138_s30 + $0xb8] sm:$0xff]  ;;  %v181_v24 = vld [vmem:[%s1138_s30 + $0x40] sm:$0xff]  ;;  %v182_v25 = vld [vmem:[%s1138_s30 + $0x48] sm:$0xff]  ;;  %v208_v28 = vpack.c.bf16 %v180_v21, %v179_v20 }
  0x1e   : > { %923 = vmatprep.mubr.msk.bf16.mxu0 %vm229_vm1, %v207_v18  ;;  %v197_v26 = vld [vmem:[%s1138_s30 + $0xc0] sm:$0xff]  ;;  %v198_v27 = vld [vmem:[%s1138_s30 + $0xc8] sm:$0xff]  ;;  %v216_v29 = vpack.c.bf16 %v196_v23, %v195_v22  ;;  %v209_v30 = vpack.c.bf16 %v182_v25, %v181_v24  ;;  %v183_v32 = vld [vmem:[%s1138_s30 + $0x50] sm:$0xff] }
  0x1f   : > { %939 = vmatprep.mubr.msk.bf16.mxu1 %vm229_vm1, %v215_v19  ;;  %v217_v31 = vpack.c.bf16 %v198_v27, %v197_v26  ;;  %v184_v33 = vld [vmem:[%s1138_s30 + $0x58] sm:$0xff]  ;;  %v199_v34 = vld [vmem:[%s1138_s30 + $0xd0] sm:$0xff]  ;;  %v185_v36 = vld [vmem:[%s1138_s30 + $0x60] sm:$0xff] }
  0x20   : > { %v200_v35 = vld [vmem:[%s1138_s30 + $0xd8] sm:$0xff]  ;;  %v186_v37 = vld [vmem:[%s1138_s30 + $0x68] sm:$0xff]  ;;  %v201_v38 = vld [vmem:[%s1138_s30 + $0xe0] sm:$0xff]  ;;  %v210_v40 = vpack.c.bf16 %v184_v33, %v183_v32 }
  0x21   : > { %v202_v39 = vld [vmem:[%s1138_s30 + $0xe8] sm:$0xff]  ;;  %v218_v41 = vpack.c.bf16 %v200_v35, %v199_v34  ;;  %v211_v42 = vpack.c.bf16 %v186_v37, %v185_v36  ;;  %v187_v44 = vld [vmem:[%s1138_s30 + $0x70] sm:$0xff]  ;;  %v188_v45 = vld [vmem:[%s1138_s30 + $0x78] sm:$0xff] }
  0x22   : > { %v219_v43 = vpack.c.bf16 %v202_v39, %v201_v38  ;;  %v203_v46 = vld [vmem:[%s1138_s30 + $0xf0] sm:$0xff]  ;;  %v204_v47 = vld [vmem:[%s1138_s30 + $0xf8] sm:$0xff]  ;;  %v212_v48 = vpack.c.bf16 %v188_v45, %v187_v44 }
  0x23   : > { %v220_v49 = vpack.c.bf16 %v204_v47, %v203_v46 }
  0x24   : > { %924 = vmatmul.mubr.msk.bf16.gmra.mrb[4].mxu0 %vm229_vm1, %v208_v28 }
  0x25   : > { %940 = vmatmul.mubr.msk.bf16.gmra.mrb[4].mxu1 %vm229_vm1, %v216_v29  ;;  %927 = vmatprep.mubr.msk.bf16.mxu0 %vm229_vm1, %v209_v30 }
  0x26   : > { %943 = vmatprep.mubr.msk.bf16.mxu1 %vm229_vm1, %v217_v31 }
  0x2c   : > { %928 = vmatmul.mubr.msk.bf16.gmra.mrb[8].mxu0 %vm229_vm1, %v210_v40 }
  0x2d   : > { %944 = vmatmul.mubr.msk.bf16.gmra.mrb[8].mxu1 %vm229_vm1, %v218_v41  ;;  %931 = vmatprep.mubr.msk.bf16.mxu0 %vm229_vm1, %v211_v42 }
  0x2e   : > { %947 = vmatprep.mubr.msk.bf16.mxu1 %vm229_vm1, %v219_v43 }
  0x34   : > { %932 = vmatmul.mubr.msk.bf16.gmra.mrb[12].mxu0 %vm229_vm1, %v212_v48 }
  0x35   : > { %948 = vmatmul.mubr.msk.bf16.gmra.mrb[12].mxu1 %vm229_vm1, %v220_v49 }
  0xef   : > { %v921_v51 = vpop.f32.mrb[0].mxu0 }
  0xf0   : > { %v325_v52 = vadd.f32 %v921_v51, %v1191_v50  ;;  %v937_v53 = vpop.f32.mrb[0].mxu1  ;;  %v316_v54 = vpop.f32.mrb[1].mxu0 }
  0xf1   : > { %v389_v55 = vadd.f32 %v937_v53, %v1191_v50  ;;  %v317_v56 = vadd.f32 %v1191_v50, %v316_v54  ;;  %v380_v57 = vpop.f32.mrb[1].mxu1  ;;  %v922_v58 = vpop.f32.mrb[2].mxu0 }
  0xf2   : > { %v381_v59 = vadd.f32 %v1191_v50, %v380_v57  ;;  %v328_v60 = vadd.f32 %v922_v58, %v1191_v50  ;;  %v938_v61 = vpop.f32.mrb[2].mxu1  ;;  %v319_v62 = vpop.f32.mrb[3].mxu0  ;;  %v445_v2 = vmax.f32 %v325_v52, 0.0 }
  0xf3   : > { %v392_v63 = vadd.f32 %v938_v61, %v1191_v50  ;;  %v320_v0 = vadd.f32 %v1191_v50, %v319_v62  ;;  %v383_v1 = vpop.f32.mrb[3].mxu1  ;;  %v461_v5 = vmax.f32 %v389_v55, 0.0  ;;  %v443_v6 = vmax.f32 %v317_v56, 0.0 }
  0xf4   : > { %v446_v3 = vmax.f32 %v328_v60, 0.0  ;;  %v384_v4 = vadd.f32 %v1191_v50, %v383_v1  ;;  %v459_v9 = vmax.f32 %v381_v59, 0.0 }
  0xf5   : > { %v462_v7 = vmax.f32 %v392_v63, 0.0  ;;  %v444_v8 = vmax.f32 %v320_v0, 0.0 }
  0xf6   : > { %v813_v10 = vpack.c.bf16 %v446_v3, %v445_v2  ;;  %v460_v11 = vmax.f32 %v384_v4, 0.0 }
  0xf7   : > { %v853_v12 = vpack.c.bf16 %v462_v7, %v461_v5  ;;  %v808_v13 = vpack.c.bf16 %v444_v8, %v443_v6  ;;  %v925_v14 = vpop.f32.mrb[4].mxu0 }
  0xf8   : > { %885 = vst [vmem:[%s1204_s8 + $0x8] sm:$0xff] %v813_v10   ;;  %v848_v15 = vpack.c.bf16 %v460_v11, %v459_v9  ;;  %v341_v16 = vadd.f32 %v925_v14, %v1191_v50  ;;  %v941_v17 = vpop.f32.mrb[4].mxu1  ;;  %v332_v18 = vpop.f32.mrb[5].mxu0 }
  0xf9   : > { %893 = vst [vmem:[%s1204_s8 + $0x48] sm:$0xff] %v853_v12   ;;  %809 = vst [vmem:[%s1204_s8] sm:$0xff] %v808_v13   ;;  %v405_v19 = vadd.f32 %v941_v17, %v1191_v50  ;;  %v333_v20 = vadd.f32 %v1191_v50, %v332_v18  ;;  %v396_v21 = vpop.f32.mrb[5].mxu1  ;;  %v926_v22 = vpop.f32.mrb[6].mxu0 }
  0xfa   : > { %892 = vst [vmem:[%s1204_s8 + $0x40] sm:$0xff] %v848_v15   ;;  %v397_v23 = vadd.f32 %v1191_v50, %v396_v21  ;;  %v344_v24 = vadd.f32 %v926_v22, %v1191_v50  ;;  %v942_v25 = vpop.f32.mrb[6].mxu1  ;;  %v335_v26 = vpop.f32.mrb[7].mxu0  ;;  %v449_v30 = vmax.f32 %v341_v16, 0.0 }
  0xfb   : > { %v408_v27 = vadd.f32 %v942_v25, %v1191_v50  ;;  %v336_v28 = vadd.f32 %v1191_v50, %v335_v26  ;;  %v399_v29 = vpop.f32.mrb[7].mxu1  ;;  %v465_v33 = vmax.f32 %v405_v19, 0.0  ;;  %v447_v34 = vmax.f32 %v333_v20, 0.0 }
  0xfc   : > { %v450_v31 = vmax.f32 %v344_v24, 0.0  ;;  %v400_v32 = vadd.f32 %v1191_v50, %v399_v29  ;;  %v463_v37 = vmax.f32 %v397_v23, 0.0 }
  0xfd   : > { %v466_v35 = vmax.f32 %v408_v27, 0.0  ;;  %v448_v36 = vmax.f32 %v336_v28, 0.0 }
  0xfe   : > { %v823_v38 = vpack.c.bf16 %v450_v31, %v449_v30  ;;  %v464_v39 = vmax.f32 %v400_v32, 0.0 }
  0xff   : > { %v863_v40 = vpack.c.bf16 %v466_v35, %v465_v33  ;;  %v818_v41 = vpack.c.bf16 %v448_v36, %v447_v34  ;;  %v929_v42 = vpop.f32.mrb[8].mxu0 }
 0x100   : > { %887 = vst [vmem:[%s1204_s8 + $0x18] sm:$0xff] %v823_v38   ;;  %v858_v43 = vpack.c.bf16 %v464_v39, %v463_v37  ;;  %v357_v44 = vadd.f32 %v929_v42, %v1191_v50  ;;  %v945_v45 = vpop.f32.mrb[8].mxu1  ;;  %v348_v46 = vpop.f32.mrb[9].mxu0 }
 0x101   : > { %895 = vst [vmem:[%s1204_s8 + $0x58] sm:$0xff] %v863_v40   ;;  %886 = vst [vmem:[%s1204_s8 + $0x10] sm:$0xff] %v818_v41   ;;  %v421_v47 = vadd.f32 %v945_v45, %v1191_v50  ;;  %v349_v48 = vadd.f32 %v1191_v50, %v348_v46  ;;  %v412_v49 = vpop.f32.mrb[9].mxu1  ;;  %v930_v51 = vpop.f32.mrb[10].mxu0 }
 0x102   : > { %894 = vst [vmem:[%s1204_s8 + $0x50] sm:$0xff] %v858_v43   ;;  %v413_v52 = vadd.f32 %v1191_v50, %v412_v49  ;;  %v360_v53 = vadd.f32 %v930_v51, %v1191_v50  ;;  %v946_v54 = vpop.f32.mrb[10].mxu1  ;;  %v351_v55 = vpop.f32.mrb[11].mxu0  ;;  %v453_v59 = vmax.f32 %v357_v44, 0.0 }
 0x103   : > { %v424_v56 = vadd.f32 %v946_v54, %v1191_v50  ;;  %v352_v57 = vadd.f32 %v1191_v50, %v351_v55  ;;  %v415_v58 = vpop.f32.mrb[11].mxu1  ;;  %v469_v62 = vmax.f32 %v421_v47, 0.0  ;;  %v451_v63 = vmax.f32 %v349_v48, 0.0 }
 0x104   : > { %v454_v60 = vmax.f32 %v360_v53, 0.0  ;;  %v416_v61 = vadd.f32 %v1191_v50, %v415_v58  ;;  %v467_v2 = vmax.f32 %v413_v52, 0.0 }
 0x105   : > { %v470_v0 = vmax.f32 %v424_v56, 0.0  ;;  %v452_v1 = vmax.f32 %v352_v57, 0.0 }
 0x106   : > { %v833_v3 = vpack.c.bf16 %v454_v60, %v453_v59  ;;  %v468_v4 = vmax.f32 %v416_v61, 0.0 }
 0x107   : > { %v873_v5 = vpack.c.bf16 %v470_v0, %v469_v62  ;;  %v828_v6 = vpack.c.bf16 %v452_v1, %v451_v63  ;;  %v933_v7 = vpop.f32.mrb[12].mxu0 }
 0x108   : > { %889 = vst [vmem:[%s1204_s8 + $0x28] sm:$0xff] %v833_v3   ;;  %v868_v8 = vpack.c.bf16 %v468_v4, %v467_v2  ;;  %v373_v9 = vadd.f32 %v933_v7, %v1191_v50  ;;  %v949_v10 = vpop.f32.mrb[12].mxu1  ;;  %v364_v11 = vpop.f32.mrb[13].mxu0 }
 0x109   : > { %897 = vst [vmem:[%s1204_s8 + $0x68] sm:$0xff] %v873_v5   ;;  %888 = vst [vmem:[%s1204_s8 + $0x20] sm:$0xff] %v828_v6   ;;  %v437_v12 = vadd.f32 %v949_v10, %v1191_v50  ;;  %v365_v13 = vadd.f32 %v1191_v50, %v364_v11  ;;  %v428_v14 = vpop.f32.mrb[13].mxu1  ;;  %v934_v15 = vpop.f32.mrb[14].mxu0 }
 0x10a   : > { %896 = vst [vmem:[%s1204_s8 + $0x60] sm:$0xff] %v868_v8   ;;  %v429_v16 = vadd.f32 %v1191_v50, %v428_v14  ;;  %v376_v17 = vadd.f32 %v934_v15, %v1191_v50  ;;  %v950_v18 = vpop.f32.mrb[14].mxu1  ;;  %v367_v19 = vpop.f32.mrb[15].mxu0  ;;  %v457_v23 = vmax.f32 %v373_v9, 0.0 }
 0x10b   : > { %v440_v20 = vadd.f32 %v950_v18, %v1191_v50  ;;  %v368_v21 = vadd.f32 %v1191_v50, %v367_v19  ;;  %v431_v22 = vpop.f32.mrb[15].mxu1  ;;  %v473_v26 = vmax.f32 %v437_v12, 0.0  ;;  %v455_v27 = vmax.f32 %v365_v13, 0.0 }
 0x10c   : > { %v458_v24 = vmax.f32 %v376_v17, 0.0  ;;  %v432_v25 = vadd.f32 %v1191_v50, %v431_v22  ;;  %v471_v30 = vmax.f32 %v429_v16, 0.0 }
 0x10d   : > { %v474_v28 = vmax.f32 %v440_v20, 0.0  ;;  %v456_v29 = vmax.f32 %v368_v21, 0.0 }
 0x10e   : > { %v843_v31 = vpack.c.bf16 %v458_v24, %v457_v23  ;;  %v472_v32 = vmax.f32 %v432_v25, 0.0 }
 0x10f   : > { %v883_v33 = vpack.c.bf16 %v474_v28, %v473_v26  ;;  %v838_v34 = vpack.c.bf16 %v456_v29, %v455_v27 }
 0x110   : > { %891 = vst [vmem:[%s1204_s8 + $0x38] sm:$0xff] %v843_v31   ;;  %v878_v50 = vpack.c.bf16 %v472_v32, %v471_v30 }
 0x111   : > { %899 = vst [vmem:[%s1204_s8 + $0x78] sm:$0xff] %v883_v33   ;;  %890 = vst [vmem:[%s1204_s8 + $0x30] sm:$0xff] %v838_v34  }
 0x112   : > { %898 = vst [vmem:[%s1204_s8 + $0x70] sm:$0xff] %v878_v50  }
 0x113   : > { %1009 = shalt.err (!%p1006_p3)
}
 0x114   : > { %s1010_s27 = scalar_lea.hbm %s1247_s19, 2048  ;;  %s1014_s30 = scalar_lea.hbm %s1301_s3, 4096 }
 0x115   : > { %p1011_p4 = scmp.ne.s32.totalorder %s1247_s19, %s1010_s27  ;;  %p1015_p9 = scmp.lt.u32.totalorder %s1247_s19, %s1301_s3 }
 0x116   : > { %p1016_p10 = scmp.lt.u32.totalorder %s1014_s30, %s1010_s27  ;;  %p1018_p12 = scmp.lt.u32.totalorder %s1010_s27, %s1247_s19 }
 0x117   : > { %p1012_p7 = pnand %p1011_p4, %p1121_p5 }
 0x118   : > { %p1017_p11 = por %p1016_p10, %p1015_p9 }
 0x119   : > { %p1013_p8 = pneg %p1012_p7 }
 0x11a   : > { %p1019_p13 = por %p1018_p12, %p1017_p11 }
 0x11c   : > { %p1020_p0 = pnand %p1019_p13, %p1013_p8 }
 0x11e   : > { %1023 = shalt.err (!%p1020_p0)
}
 0x11f   : > { %s1061_s6 = smov 64   ;;  %s1062_s7 = smov 4  }
 0x120   : > { %955 = dma.vmem_to_hbm [thread:$0]  (%p1121_p5), %s1249_s10, 2048, %s1247_s19, %s1257_s16, %s1061_s6, %s1061_s6, %s1062_s7  }
 0x121 PF: > { %p961_p1 = scmp.ge.s32.totalorder %s1058_s15, 2  ;;  %s664_s8 = sand.u32 1, %s1046_s12  }
 0x122   : > { %s665_s9 = scalar_lea.sflag [#allocation3], %s664_s8 }
 0x123   : > { %p958_p2 = pnand %p961_p1, %p1125_p6 }
 0x125   : > { %1041 = dma.done.wait (!%p958_p2), %s665_s9, 2048  }
 0x126   : > { %1043 = vsyncadd (!%p958_p2), %s665_s9, 4294965248  ;;  %p13_p3 = scmp.ge.s32.totalorder %s1108_s18, 4   ;;  %s1304_s12 = smov %s1050_s13 }
 0x127   : > { %s1305_s13 = smov %s1054_s14  ;;  %s1306_s14 = smov %s1119_s21 }
 0x128   : > { %s1307_s15 = smov %s1108_s18  ;;  %15 = sbr.rel (!%p13_p3) target bundleno = 3 (0x3), region = 67 }
 0x12f   :  { %670 = vsyncpa [#allocation3], 1 }
 0x130   :  { %672 = vsyncpa [#allocation3 + $0x1], 1 }

</bundles_post_ra>
